<compile_context>
chip_gen: v5e
topology: v5e:2x2
jax: 0.10.0
libtpu: 0.0.40
codegen_flags: <defaults>
</compile_context>

<pallas_src>
import functools

import jax
import jax.numpy as jnp
from jax import lax
from jax.experimental import pallas as pl
from jax.experimental.pallas import tpu as pltpu


# ----------------------------- kernel 1: fused QKV projection -----------------------------
def _qkv_proj_kernel(x_ref, w_ref, qkv_ref):
    # x_ref: (tm, C) input dtype; w_ref: (C, 3*H*D) bf16; qkv_ref: (tm, 3*H*D) bf16.
    x = x_ref[...].astype(w_ref.dtype)          # cast in-kernel; x stays in its HBM dtype
    qkv_ref[...] = jnp.dot(
        x, w_ref[...], preferred_element_type=jnp.float32).astype(qkv_ref.dtype)


def _split_heads(m2d, H, D):
    # (n, H*D) -> (H, n, D) via static lane slices + leading-dim stack (Mosaic-friendly).
    return jnp.stack([m2d[:, h * D:(h + 1) * D] for h in range(H)], axis=0)


# --------------- kernel 2: flash attention (causal, online softmax) + output projection ---------------
def _flash_attn_proj_kernel(q_ref, k_ref, v_ref, wp_ref, bp_ref, o_ref,
                            qh_scr, m_scr, l_scr, acc_scr, *, num_heads, head_dim):
    H, D = num_heads, head_dim
    TQ = q_ref.shape[1]
    TKV = k_ref.shape[1]
    qi = pl.program_id(1)
    ki = pl.program_id(2)
    nk = pl.num_programs(2)

    q_start = qi * TQ
    k_start = ki * TKV

    @pl.when(ki == 0)
    def _init():
        m_scr[...] = jnp.full_like(m_scr, -jnp.inf)
        l_scr[...] = jnp.zeros_like(l_scr)
        acc_scr[...] = jnp.zeros_like(acc_scr)
        # Head-split q is reused across every kv step of this q tile.
        qh_scr[...] = _split_heads(q_ref[0], H, D)

    def _scores():
        k_h = _split_heads(k_ref[0], H, D)                       # (H, TKV, D) bf16
        # softmax scale is already folded into the Q projection weights
        return jnp.einsum("hqd,hkd->hqk", qh_scr[...], k_h,
                          preferred_element_type=jnp.float32)    # (H, TQ, TKV) f32

    def _online_softmax_update(s):
        m_prev = m_scr[...]                                       # (H, TQ, 1)
        m_new = jnp.maximum(m_prev, jnp.max(s, axis=-1, keepdims=True))
        alpha = jnp.exp(m_prev - m_new)
        p = jnp.exp(s - m_new)                                    # (H, TQ, TKV) f32
        l_scr[...] = alpha * l_scr[...] + jnp.sum(p, axis=-1, keepdims=True)
        v_h = _split_heads(v_ref[0], H, D)                        # (H, TKV, D) bf16
        acc_scr[...] = alpha * acc_scr[...] + jnp.einsum(
            "hqk,hkd->hqd", p.astype(v_ref.dtype), v_h,
            preferred_element_type=jnp.float32)
        m_scr[...] = m_new

    # Block classification (keep in sync with the clamping kv index_map in the wrapper).
    visible = k_start <= q_start + TQ - 1          # block intersects the causal triangle
    diagonal = k_start + TKV - 1 > q_start         # block needs an explicit causal mask

    @pl.when(visible & jnp.logical_not(diagonal))
    def _interior_block():                          # strictly below the diagonal: no mask work
        _online_softmax_update(_scores())

    @pl.when(visible & diagonal)
    def _diagonal_block():
        s = _scores()
        qpos = q_start + lax.broadcasted_iota(jnp.int32, (TQ, TKV), 0)
        kpos = k_start + lax.broadcasted_iota(jnp.int32, (TQ, TKV), 1)
        s = jnp.where((kpos <= qpos)[None, :, :], s, -jnp.inf)
        _online_softmax_update(s)

    @pl.when(ki == nk - 1)
    def _finalize():
        # Exact normalization (approx reciprocal previously caused the 6e-3 mismatch).
        o_h = acc_scr[...] * (1.0 / l_scr[...])                   # (H, TQ, D) f32
        o_cat = jnp.concatenate([o_h[h] for h in range(H)], axis=-1)   # (TQ, H*D)
        out = jnp.dot(o_cat.astype(wp_ref.dtype), wp_ref[...],
                      preferred_element_type=jnp.float32) + bp_ref[...]
        o_ref[0] = out.astype(o_ref.dtype)


# ----------------------------- wrapper -----------------------------
def multi_head_attention(x, wq, wk, wv, w_proj, b_proj, *,
                         tm=None, tq=None, tkv=None, compute_dtype=jnp.bfloat16):
    """
    x:        (B, T, C)
    wq/wk/wv: (H, C, D)   per-head projection weights, (in, out) orientation
    w_proj:   (H*D, C),  b_proj: (C,)
    returns   (B, T, C)
    """
    B, T, C = x.shape
    H, _, D = wq.shape
    HD = H * D

    tq = tq or min(T, 128)
    tkv = tkv or min(T, 256)
    assert T % tq == 0 and T % tkv == 0, "T must be divisible by the attention tiles"
    assert tq % 8 == 0 and tkv % 8 == 0 and HD % 128 == 0, "tiles must satisfy (8,128) tiling"
    if tm is None:
        tm = next(c for c in (512, 256, 128, 64, 32, 16, 8) if (B * T) % c == 0)
    assert (B * T) % tm == 0

    # Pack per-head weights into a single fused, lane-dense (C, 3*HD) bf16 matrix.
    # Fold the 1/sqrt(D) softmax scale into the Q columns (mathematically identical).
    scale = float(D) ** -0.5
    wq_f = jnp.transpose(wq, (1, 0, 2)).reshape(C, HD) * scale
    wk_f = jnp.transpose(wk, (1, 0, 2)).reshape(C, HD)
    wv_f = jnp.transpose(wv, (1, 0, 2)).reshape(C, HD)
    w_qkv = jnp.concatenate([wq_f, wk_f, wv_f], axis=1).astype(compute_dtype)   # (C, 3HD)
    wp = w_proj.astype(compute_dtype)                                           # (HD, C)
    bp = b_proj.reshape(1, C).astype(jnp.float32)

    # ---- kernel 1: fused QKV projection over a flattened (B*T, C) view ----
    qkv = pl.pallas_call(
        _qkv_proj_kernel,
        out_shape=jax.ShapeDtypeStruct((B * T, 3 * HD), compute_dtype),
        grid=((B * T) // tm,),
        in_specs=[
            pl.BlockSpec((tm, C), lambda i: (i, 0)),
            pl.BlockSpec((C, 3 * HD), lambda i: (0, 0)),
        ],
        out_specs=pl.BlockSpec((tm, 3 * HD), lambda i: (i, 0)),
        compiler_params=pltpu.CompilerParams(
            dimension_semantics=("parallel",),
            vmem_limit_bytes=32 * 1024 * 1024),
    )(x.reshape(B * T, C), w_qkv)
    qkv = qkv.reshape(B, T, 3 * HD)

    # ---- kernel 2: flash attention + output projection ----
    nq, nkv = T // tq, T // tkv

    def _last_visible_kv_block(qi):
        # last kv block index intersecting the causal triangle for q tile `qi`
        return (qi * tq + tq - 1) // tkv

    def q_map(b, qi, ki):
        return (b, qi, 0)

    def k_map(b, qi, ki):
        # Clamp fully-masked (future) kv blocks to the last visible one so the pipeline
        # never fetches blocks whose compute is skipped (repeated block index -> no DMA).
        return (b, jnp.minimum(ki, _last_visible_kv_block(qi)), 1)

    def v_map(b, qi, ki):
        return (b, jnp.minimum(ki, _last_visible_kv_block(qi)), 2)

    out = pl.pallas_call(
        functools.partial(_flash_attn_proj_kernel, num_heads=H, head_dim=D),
        out_shape=jax.ShapeDtypeStruct((B, T, C), x.dtype),
        grid=(B, nq, nkv),
        in_specs=[
            pl.BlockSpec((1, tq, HD), q_map),     # Q slab of the fused qkv array
            pl.BlockSpec((1, tkv, HD), k_map),    # K slab
            pl.BlockSpec((1, tkv, HD), v_map),    # V slab
            pl.BlockSpec((HD, C), lambda b, qi, ki: (0, 0)),
            pl.BlockSpec((1, C), lambda b, qi, ki: (0, 0)),
        ],
        out_specs=pl.BlockSpec((1, tq, C), lambda b, qi, ki: (b, qi, 0)),
        scratch_shapes=[
            pltpu.VMEM((H, tq, D), compute_dtype),   # head-split q (reused across kv steps)
            pltpu.VMEM((H, tq, 1), jnp.float32),     # running max per head
            pltpu.VMEM((H, tq, 1), jnp.float32),     # running sum per head
            pltpu.VMEM((H, tq, D), jnp.float32),     # output accumulator per head
        ],
        compiler_params=pltpu.CompilerParams(
            dimension_semantics=("parallel", "parallel", "arbitrary"),
            vmem_limit_bytes=32 * 1024 * 1024),
    )(qkv, qkv, qkv, wp, bp)

    return out


if __name__ == "__main__":
    # small shapes consistent with the module (block_size kept, n_embd scaled down 384 -> 128)
    B = 2
    T = 128                          # == block_size
    n_embd = 128
    num_heads = 4
    head_size = n_embd // num_heads  # 32

    key = jax.random.PRNGKey(0)
    kx, kq, kk, kv, kp, kb = jax.random.split(key, 6)

    x = jax.random.normal(kx, (B, T, n_embd), dtype=jnp.float32)

    s = n_embd ** -0.5
    wq = jax.random.normal(kq, (num_heads, n_embd, head_size), jnp.float32) * s
    wk = jax.random.normal(kk, (num_heads, n_embd, head_size), jnp.float32) * s
    wv = jax.random.normal(kv, (num_heads, n_embd, head_size), jnp.float32) * s
    w_proj = jax.random.normal(kp, (num_heads * head_size, n_embd), jnp.float32) * s
    b_proj = jax.random.normal(kb, (n_embd,), jnp.float32) * 0.01

    # pure-JAX f32 reference (matches the PyTorch module in eval mode; dropout = identity)
    def ref(x):
        outs = []
        for h in range(num_heads):
            qh = x @ wq[h]; kh = x @ wk[h]; vh = x @ wv[h]
            wei = (qh @ jnp.swapaxes(kh, -1, -2)) * head_size ** -0.5
            mask = jnp.tril(jnp.ones((T, T), bool))
            wei = jnp.where(mask, wei, -jnp.inf)
            wei = jax.nn.softmax(wei, axis=-1)
            outs.append(wei @ vh)
        y = jnp.concatenate(outs, axis=-1)
        return y @ w_proj + b_proj

    r = ref(x)

    def check(out, tag):
        out = jax.block_until_ready(out)
        err = float(jnp.max(jnp.abs(out - r)))
        rel = float(jnp.linalg.norm(out - r) / jnp.linalg.norm(r))
        # q/k/v and weights are stored/computed in bf16 (per perf review) with f32
        # accumulation, so tolerances are bf16-level (reference is full f32).
        ok = bool(jnp.allclose(out, r, atol=5e-2, rtol=5e-2)) and rel < 3e-2
        assert ok, f"[{tag}] mismatch vs reference: max abs err {err}, rel l2 {rel}"

    # default tiles (tq=128, tkv=128 for T=128): single diagonal kv block per q tile
    out = multi_head_attention(x, wq, wk, wv, w_proj, b_proj)
    check(out, "tiles=default")

    # smaller tiles exercise multi-block online softmax, the interior/diagonal split and
    # the clamped (skipped) future-kv blocks
    out_small = multi_head_attention(x, wq, wk, wv, w_proj, b_proj, tq=64, tkv=64)
    check(out_small, "tiles=64")

    print("KERNEL_OK")
</pallas_src>

<mosaic_0001>
module attributes {stable_mosaic.version = 11 : i64} {
  func.func @_qkv_proj_kernel(%arg0: i32, %arg1: memref<256x128xf32, #tpu.memory_space<vmem>>, %arg2: memref<128x384xbf16, #tpu.memory_space<vmem>>, %arg3: memref<256x384xbf16, #tpu.memory_space<vmem>>) attributes {dimension_semantics = [#tpu.dimension_semantics<parallel>], iteration_bounds = array<i64: 1>, scalar_prefetch = 0 : i64, scratch_operands = 0 : i64, tpu.core_type = #tpu.core_type<tc>, window_params = [{transform_indices = @transform_0, window_bounds = array<i64: 256, 128>}, {pipeline_mode = #tpu.pipeline_mode<synchronous>, transform_indices = @transform_1, window_bounds = array<i64: 128, 384>}, {transform_indices = @transform_2, window_bounds = array<i64: 256, 384>}]} {
    %c0 = arith.constant 0 : index
    %c0_0 = arith.constant 0 : index
    %0 = vector.load %arg1[%c0, %c0_0] : memref<256x128xf32, #tpu.memory_space<vmem>>, vector<256x128xf32>
    %1 = arith.truncf %0 : vector<256x128xf32> to vector<256x128xbf16>
    %c0_1 = arith.constant 0 : index
    %c0_2 = arith.constant 0 : index
    %2 = vector.load %arg2[%c0_1, %c0_2] : memref<128x384xbf16, #tpu.memory_space<vmem>>, vector<128x384xbf16>
    %cst = arith.constant dense<0.000000e+00> : vector<256x384xf32>
    %3 = tpu.matmul %1, %2, %cst {dimension_numbers = #tpu.dot_dimension_numbers<[1], [0], [0], [1], [0, 0, 1, 1], [], []>} : vector<256x128xbf16>, vector<128x384xbf16>, vector<256x384xf32> -> vector<256x384xf32>
    %4 = arith.truncf %3 : vector<256x384xf32> to vector<256x384xbf16>
    %c0_3 = arith.constant 0 : index
    %c0_4 = arith.constant 0 : index
    %5 = vector.load %arg3[%c0_3, %c0_4] : memref<256x384xbf16, #tpu.memory_space<vmem>>, vector<256x384xbf16>
    tpu.vector_store %arg3[%c0_3, %c0_4], %4 {strides = array<i32>} : memref<256x384xbf16, #tpu.memory_space<vmem>>, vector<256x384xbf16>,
    return
  }
  func.func @transform_0(%arg0: i32) -> (i32, i32) {
    %c0_i32 = arith.constant 0 : i32
    %c0_i32_0 = arith.constant 0 : i32
    return %arg0, %c0_i32 : i32, i32
  }
  func.func @transform_1(%arg0: i32) -> (i32, i32) {
    %c0_i32 = arith.constant 0 : i32
    %c0_i32_0 = arith.constant 0 : i32
    %c0_i32_1 = arith.constant 0 : i32
    return %c0_i32, %c0_i32_0 : i32, i32
  }
  func.func @transform_2(%arg0: i32) -> (i32, i32) {
    %c0_i32 = arith.constant 0 : i32
    %c0_i32_0 = arith.constant 0 : i32
    return %arg0, %c0_i32 : i32, i32
  }
}

</mosaic_0001>

<bundles_post_ra>
// kernel: tpu_custom_call.1
= control target key start
LH: loop header
LB: loop body
LE: loop exit
PB: predicated region body
PF: predicated region fallthrough
CT: control target
= control target key end

     0   :  { %7 = vsyncpa [#allocation3], 0  ;;  %s1025_s0 = inlined_call_operand.hbm [shape: f32[256,128], index: 0, kind: input, shape index: {}]   ;;  %s1026_s1 = inlined_call_operand.hbm [shape: bf16[128,384], index: 1, kind: input, shape index: {}]   ;;  %s1027_s2 = inlined_call_operand.hbm [shape: bf16[256,384], index: 2, kind: output, shape index: {}]  }
   0x1   :  { %8 = vsyncpa [#allocation6], 0 }
   0x2   :  { %9 = vsyncpa [#allocation4], 0  ;;  %s14_s11 = sshll.u32 %s1025_s0, 4  ;;  %s896_s12 = smov [#allocation2]   ;;  %s15_s11 = int_to_ptr.hbm [resolvable:$true] %s14_s11 }
   0x3   :  { %s16_s13 = sshll.u32 %s896_s12, 4  ;;  %s27_s16 = sshll.u32 %s1026_s1, 4  ;;  %s17_s13 = int_to_ptr.vmem [resolvable:$true] %s16_s13  ;;  %s28_s16 = int_to_ptr.hbm [resolvable:$true] %s27_s16 }
   0x4   :  { %s897_s17 = smov 128   ;;  %s898_s18 = smov 8  }
   0x5   :  { %22 = dma.hbm_to_vmem [thread:$0]  %s15_s11, 4096, %s17_s13, [#allocation3], %s897_s17, %s897_s17, %s898_s18  }
   0x6   :  { %s899_s19 = smov [#allocation5]   ;;  %s900_s21 = smov 192  }
   0x7   :  { %s29_s20 = sshll.u32 %s899_s19, 4  ;;  %s901_s22 = smov 12   ;;  %s30_s20 = int_to_ptr.vmem [resolvable:$true] %s29_s20 }
   0x8   :  { %35 = dma.hbm_to_vmem [thread:$0]  %s28_s16, 3072, %s30_s20, [#allocation6], %s900_s21, %s900_s21, %s901_s22  }
   0x9   :  { %890 = dma.done.wait [#allocation3], 4096  }
   0xa   :  { %891 = vsyncadd [#allocation3], 4294963200 }
   0xb   :  { %892 = dma.done.wait [#allocation6], 3072  }
   0xc   :  { %893 = vsyncadd [#allocation6], 4294964224  ;;  %v753_v0 = vld [vmem:[#allocation5 + $0xa8] sm:$0xf]  ;;  %v785_v1 = vld [vmem:[#allocation5 + $0xb0] sm:$0xf0] }
   0xd   :  { %v784_v2 = vld [vmem:[#allocation5 + $0xac] sm:$0xf]  ;;  %v754_v3 = vor.u32 %v785_v1, %v753_v0  ;;  %v755_v4 = vld [vmem:[#allocation5 + $0xb4] sm:$0xf0]  ;;  %v761_v5 = vld [vmem:[#allocation5 + $0xb0] sm:$0xf] }
   0xe   :  { %v786_v6 = vld [vmem:[#allocation5 + $0xb8] sm:$0xf0]  ;;  %v927_v7 = vor.u32 %v784_v2, %v755_v4  ;;  %v741_v9 = vld [vmem:[#allocation5 + $0x90] sm:$0xf]  ;;  %v781_v11 = vld [vmem:[#allocation5 + $0x94] sm:$0xf] }
   0xf   :  { %v929_v8 = vor.u32 %v786_v6, %v761_v5  ;;  %v782_v10 = vld [vmem:[#allocation5 + $0x98] sm:$0xf0]  ;;  %252 = vmatpush.bf16.msra.mxu0 %v754_v3  ;;  %787 = vmatpush.bf16.msra.mxu3 %v754_v3  ;;  %v743_v13 = vld [vmem:[#allocation5 + $0x9c] sm:$0xf0]  ;;  %v749_v14 = vld [vmem:[#allocation5 + $0x98] sm:$0xf] }
  0x10   :  { %v742_v12 = vor.u32 %v782_v10, %v741_v9  ;;  %v783_v15 = vld [vmem:[#allocation5 + $0xa0] sm:$0xf0]  ;;  %341 = vmatpush.bf16.msra.mxu1 %v927_v7  ;;  %v933_v16 = vor.u32 %v781_v11, %v743_v13  ;;  %v729_v18 = vld [vmem:[#allocation5 + $0x78] sm:$0xf]  ;;  %v778_v20 = vld [vmem:[#allocation5 + $0x7c] sm:$0xf] }
  0x11   :  { %430 = vmatpush.bf16.msra.mxu2 %v929_v8  ;;  %v935_v17 = vor.u32 %v783_v15, %v749_v14  ;;  %v779_v19 = vld [vmem:[#allocation5 + $0x80] sm:$0xf0]  ;;  %v731_v21 = vld [vmem:[#allocation5 + $0x84] sm:$0xf0]  ;;  %v737_v22 = vld [vmem:[#allocation5 + $0x80] sm:$0xf] }
  0x12   :  { %v780_v23 = vld [vmem:[#allocation5 + $0x88] sm:$0xf0]  ;;  %v730_v24 = vor.u32 %v779_v19, %v729_v18  ;;  %v939_v25 = vor.u32 %v778_v20, %v731_v21  ;;  %v717_v27 = vld [vmem:[#allocation5 + $0x60] sm:$0xf]  ;;  %v775_v29 = vld [vmem:[#allocation5 + $0x64] sm:$0xf] }
  0x13   :  { %253 = vmatpush.bf16.msra.mxu0 %v742_v12  ;;  %788 = vmatpush.bf16.msra.mxu3 %v742_v12  ;;  %v941_v26 = vor.u32 %v780_v23, %v737_v22  ;;  %v776_v28 = vld [vmem:[#allocation5 + $0x68] sm:$0xf0]  ;;  %v719_v30 = vld [vmem:[#allocation5 + $0x6c] sm:$0xf0]  ;;  %v725_v31 = vld [vmem:[#allocation5 + $0x68] sm:$0xf] }
  0x14   :  { %342 = vmatpush.bf16.msra.mxu1 %v933_v16  ;;  %v777_v32 = vld [vmem:[#allocation5 + $0x70] sm:$0xf0]  ;;  %v718_v33 = vor.u32 %v776_v28, %v717_v27  ;;  %v945_v34 = vor.u32 %v775_v29, %v719_v30  ;;  %v705_v36 = vld [vmem:[#allocation5 + $0x48] sm:$0xf]  ;;  %v772_v38 = vld [vmem:[#allocation5 + $0x4c] sm:$0xf] }
  0x15   :  { %431 = vmatpush.bf16.msra.mxu2 %v935_v17  ;;  %v947_v35 = vor.u32 %v777_v32, %v725_v31  ;;  %v773_v37 = vld [vmem:[#allocation5 + $0x50] sm:$0xf0]  ;;  %v707_v39 = vld [vmem:[#allocation5 + $0x54] sm:$0xf0]  ;;  %v713_v40 = vld [vmem:[#allocation5 + $0x50] sm:$0xf] }
  0x16   :  { %v774_v41 = vld [vmem:[#allocation5 + $0x58] sm:$0xf0]  ;;  %v706_v42 = vor.u32 %v773_v37, %v705_v36  ;;  %v951_v43 = vor.u32 %v772_v38, %v707_v39  ;;  %v693_v45 = vld [vmem:[#allocation5 + $0x30] sm:$0xf]  ;;  %v769_v47 = vld [vmem:[#allocation5 + $0x34] sm:$0xf] }
  0x17   :  { %254 = vmatpush.bf16.msra.mxu0 %v730_v24  ;;  %789 = vmatpush.bf16.msra.mxu3 %v730_v24  ;;  %v953_v44 = vor.u32 %v774_v41, %v713_v40  ;;  %v770_v46 = vld [vmem:[#allocation5 + $0x38] sm:$0xf0]  ;;  %v695_v48 = vld [vmem:[#allocation5 + $0x3c] sm:$0xf0]  ;;  %v701_v49 = vld [vmem:[#allocation5 + $0x38] sm:$0xf] }
  0x18   :  { %343 = vmatpush.bf16.msra.mxu1 %v939_v25  ;;  %v771_v50 = vld [vmem:[#allocation5 + $0x40] sm:$0xf0]  ;;  %v694_v51 = vor.u32 %v770_v46, %v693_v45  ;;  %v698_v52 = vor.u32 %v769_v47, %v695_v48  ;;  %v681_v54 = vld [vmem:[#allocation5 + $0x18] sm:$0xf]  ;;  %v766_v56 = vld [vmem:[#allocation5 + $0x1c] sm:$0xf] }
  0x19   :  { %432 = vmatpush.bf16.msra.mxu2 %v941_v26  ;;  %v957_v53 = vor.u32 %v771_v50, %v701_v49  ;;  %v767_v55 = vld [vmem:[#allocation5 + $0x20] sm:$0xf0]  ;;  %v683_v57 = vld [vmem:[#allocation5 + $0x24] sm:$0xf0]  ;;  %v689_v58 = vld [vmem:[#allocation5 + $0x20] sm:$0xf] }
  0x1a   :  { %v768_v59 = vld [vmem:[#allocation5 + $0x28] sm:$0xf0]  ;;  %v682_v60 = vor.u32 %v767_v55, %v681_v54  ;;  %v686_v61 = vor.u32 %v766_v56, %v683_v57  ;;  %v669_v63 = vld [vmem:[#allocation5] sm:$0xf]  ;;  %v763_v1 = vld [vmem:[#allocation5 + $0x4] sm:$0xf] }
  0x1b   :  { %255 = vmatpush.bf16.msra.mxu0 %v718_v33  ;;  %790 = vmatpush.bf16.msra.mxu3 %v718_v33  ;;  %v960_v62 = vor.u32 %v768_v59, %v689_v58  ;;  %v764_v0 = vld [vmem:[#allocation5 + $0x8] sm:$0xf0]  ;;  %v671_v2 = vld [vmem:[#allocation5 + $0xc] sm:$0xf0]  ;;  %v677_v3 = vld [vmem:[#allocation5 + $0x8] sm:$0xf] }
  0x1c   :  { %344 = vmatpush.bf16.msra.mxu1 %v945_v34  ;;  %v765_v4 = vld [vmem:[#allocation5 + $0x10] sm:$0xf0]  ;;  %v44_v5 = vld [vmem:[#allocation2] sm:$0xff]  ;;  %v670_v6 = vor.u32 %v764_v0, %v669_v63  ;;  %v45_v9 = vld [vmem:[#allocation2 + $0x8] sm:$0xff]  ;;  %v674_v12 = vor.u32 %v763_v1, %v671_v2  ;;  %s902_s0 = smov [#allocation7]   ;;  %s653_s25 = sshll.u32 %s1027_s2, 4  ;;  %s654_s25 = int_to_ptr.hbm [resolvable:$true] %s653_s25 }
  0x1d   :  { %433 = vmatpush.bf16.msra.mxu2 %v947_v35  ;;  %v68_v10 = vld [vmem:[#allocation2 + $0xc0] sm:$0xff]  ;;  %v69_v11 = vld [vmem:[#allocation2 + $0xc8] sm:$0xff]  ;;  %v678_v13 = vor.u32 %v765_v4, %v677_v3  ;;  %v76_v14 = vpack.c.bf16 %v45_v9, %v44_v5  ;;  %v46_v18 = vld [vmem:[#allocation2 + $0x10] sm:$0xff]  ;;  %s651_s1 = sshll.u32 %s902_s0, 4  ;;  %s652_s1 = int_to_ptr.vmem [resolvable:$true] %s651_s1 }
  0x1e   :  { %v963_v15 = vpack.c.bf16 %v69_v11, %v68_v10  ;;  %v47_v19 = vld [vmem:[#allocation2 + $0x18] sm:$0xff]  ;;  %v70_v20 = vld [vmem:[#allocation2 + $0xd0] sm:$0xff]  ;;  %v72_v24 = vld [vmem:[#allocation2 + $0xe0] sm:$0xff] }
  0x1f   :  { %256 = vmatpush.bf16.msra.mxu0 %v706_v42  ;;  %791 = vmatpush.bf16.msra.mxu3 %v706_v42  ;;  %v71_v21 = vld [vmem:[#allocation2 + $0xd8] sm:$0xff]  ;;  %v77_v22 = vpack.c.bf16 %v47_v19, %v46_v18  ;;  %v50_v29 = vld [vmem:[#allocation2 + $0x30] sm:$0xff]  ;;  %v56_v38 = vld [vmem:[#allocation2 + $0x60] sm:$0xff] }
  0x20   :  { %345 = vmatpush.bf16.msra.mxu1 %v951_v43  ;;  %v970_v23 = vpack.c.bf16 %v71_v21, %v70_v20  ;;  %v51_v30 = vld [vmem:[#allocation2 + $0x38] sm:$0xff]  ;;  %v74_v31 = vld [vmem:[#allocation2 + $0xf0] sm:$0xff]  ;;  %v57_v39 = vld [vmem:[#allocation2 + $0x68] sm:$0xff] }
  0x21   :  { %434 = vmatpush.bf16.msra.mxu2 %v953_v44  ;;  %v75_v32 = vld [vmem:[#allocation2 + $0xf8] sm:$0xff]  ;;  %v79_v33 = vpack.c.bf16 %v51_v30, %v50_v29  ;;  %v82_v40 = vpack.c.bf16 %v57_v39, %v56_v38  ;;  %v58_v41 = vld [vmem:[#allocation2 + $0x70] sm:$0xff]  ;;  %v61_v45 = vld [vmem:[#allocation2 + $0x88] sm:$0xff] }
  0x22   :  { %v55_v36 = vld [vmem:[#allocation2 + $0x58] sm:$0xff]  ;;  %v62_v56 = vld [vmem:[#allocation2 + $0x90] sm:$0xff]  ;;  %v64_v9 = vld [vmem:[#allocation2 + $0xa0] sm:$0xff] }
  0x23   :  { %257 = vmatpush.bf16.msra.mxu0 %v694_v51  ;;  %792 = vmatpush.bf16.msra.mxu3 %v694_v51  ;;  %v59_v42 = vld [vmem:[#allocation2 + $0x78] sm:$0xff]  ;;  %v65_v10 = vld [vmem:[#allocation2 + $0xa8] sm:$0xff] }
  0x24   :  { %346 = vmatpush.bf16.msra.mxu1 %v698_v52  ;;  %v63_v57 = vld [vmem:[#allocation2 + $0x98] sm:$0xff] }
  0x25   :  { %435 = vmatpush.bf16.msra.mxu2 %v957_v53 }
  0x27   :  { %258 = vmatpush.bf16.msra.mxu0 %v682_v60  ;;  %793 = vmatpush.bf16.msra.mxu3 %v682_v60  ;;  %v85_v60 = vpack.c.bf16 %v63_v57, %v62_v56 }
  0x28   :  { %347 = vmatpush.bf16.msra.mxu1 %v686_v61 }
  0x29   :  { %436 = vmatpush.bf16.msra.mxu2 %v960_v62 }
  0x2b   :  { %259 = vmatpush.bf16.msra.mxu0 %v670_v6  ;;  %794 = vmatpush.bf16.msra.mxu3 %v670_v6 }
  0x2c   :  { %348 = vmatpush.bf16.msra.mxu1 %v674_v12 }
  0x2d   :  { %437 = vmatpush.bf16.msra.mxu2 %v678_v13 }
  0x2e   :  { %260 = vmatmul.bf16.vlgmr.msra.gmra.mxu0 %v76_v14  ;;  %320 = vmatmul.bf16.vlgmr.msra.gmra.mxu3 %v963_v15 }
  0x2f   :  { %795 = vmatpush.bf16.msrb.mxu3 %v927_v7  ;;  %349 = vmatmul.bf16.vlgmr.msra.gmra.mxu1 %v76_v14  ;;  %v48_v7 = vld [vmem:[#allocation2 + $0x20] sm:$0xff] }
  0x30   :  { %438 = vmatmul.bf16.vlgmr.msra.gmra.mxu2 %v76_v14 }
  0x33   :  { %796 = vmatpush.bf16.msrb.mxu3 %v933_v16  ;;  %v49_v16 = vld [vmem:[#allocation2 + $0x28] sm:$0xff] }
  0x34   :  { %v78_v27 = vpack.c.bf16 %v49_v16, %v48_v7 }
  0x37   :  { %797 = vmatpush.bf16.msrb.mxu3 %v939_v25  ;;  %v73_v25 = vld [vmem:[#allocation2 + $0xe8] sm:$0xff] }
  0x38   :  { %v974_v28 = vpack.c.bf16 %v73_v25, %v72_v24  ;;  %v66_v24 = vld [vmem:[#allocation2 + $0xb0] sm:$0xff]  ;;  %v67_v25 = vld [vmem:[#allocation2 + $0xb8] sm:$0xff] }
  0x39   :  { %v87_v30 = vpack.c.bf16 %v67_v25, %v66_v24 }
  0x3b   :  { %798 = vmatpush.bf16.msrb.mxu3 %v945_v34  ;;  %v981_v34 = vpack.c.bf16 %v75_v32, %v74_v31 }
  0x3e   :  { %265 = vmatmul.bf16.gmra.mxu0 %v77_v22  ;;  %325 = vmatmul.bf16.gmra.mxu3 %v970_v23 }
  0x3f   :  { %799 = vmatpush.bf16.msrb.mxu3 %v951_v43  ;;  %354 = vmatmul.bf16.gmra.mxu1 %v77_v22  ;;  %v83_v43 = vpack.c.bf16 %v59_v42, %v58_v41 }
  0x40   :  { %443 = vmatmul.bf16.gmra.mxu2 %v77_v22 }
  0x43   :  { %800 = vmatpush.bf16.msrb.mxu3 %v698_v52 }
  0x47   :  { %801 = vmatpush.bf16.msrb.mxu3 %v686_v61 }
  0x4b   :  { %802 = vmatpush.bf16.msrb.mxu3 %v674_v12 }
  0x4e   :  { %270 = vmatmul.bf16.gmra.mxu0 %v78_v27  ;;  %330 = vmatmul.bf16.gmra.mxu3 %v974_v28 }
  0x4f   :  { %803 = vmatpush.bf16.msra.mxu3 %v929_v8  ;;  %359 = vmatmul.bf16.gmra.mxu1 %v78_v27  ;;  %v52_v8 = vld [vmem:[#allocation2 + $0x40] sm:$0xff] }
  0x50   :  { %448 = vmatmul.bf16.gmra.mxu2 %v78_v27 }
  0x53   :  { %804 = vmatpush.bf16.msra.mxu3 %v935_v17  ;;  %v53_v17 = vld [vmem:[#allocation2 + $0x48] sm:$0xff] }
  0x57   :  { %805 = vmatpush.bf16.msra.mxu3 %v941_v26  ;;  %v80_v26 = vpack.c.bf16 %v53_v17, %v52_v8 }
  0x5b   :  { %806 = vmatpush.bf16.msra.mxu3 %v947_v35  ;;  %v54_v35 = vld [vmem:[#allocation2 + $0x50] sm:$0xff] }
  0x5c   :  { %v81_v37 = vpack.c.bf16 %v55_v36, %v54_v35 }
  0x5e   :  { %275 = vmatmul.bf16.gmra.mxu0 %v79_v33  ;;  %335 = vmatmul.bf16.gmra.mxu3 %v981_v34 }
  0x5f   :  { %807 = vmatpush.bf16.msra.mxu3 %v953_v44  ;;  %364 = vmatmul.bf16.gmra.mxu1 %v79_v33  ;;  %v60_v44 = vld [vmem:[#allocation2 + $0x80] sm:$0xff] }
  0x60   :  { %453 = vmatmul.bf16.gmra.mxu2 %v79_v33  ;;  %v84_v46 = vpack.c.bf16 %v61_v45, %v60_v44 }
  0x63   :  { %808 = vmatpush.bf16.msra.mxu3 %v957_v53 }
  0x67   :  { %809 = vmatpush.bf16.msra.mxu3 %v960_v62 }
  0x6b   :  { %810 = vmatpush.bf16.msra.mxu3 %v678_v13  ;;  %v86_v13 = vpack.c.bf16 %v65_v10, %v64_v9 }
  0x6e   :  { %280 = vmatmul.bf16.gmra.mxu0 %v80_v26  ;;  %409 = vmatmul.bf16.vlgmr.msrb.gmra.mxu3 %v963_v15 }
  0x6f   :  { %369 = vmatmul.bf16.gmra.mxu1 %v80_v26 }
  0x70   :  { %458 = vmatmul.bf16.gmra.mxu2 %v80_v26 }
  0x7e   :  { %285 = vmatmul.bf16.gmra.mxu0 %v81_v37  ;;  %414 = vmatmul.bf16.gmra.mxu3 %v970_v23 }
  0x7f   :  { %374 = vmatmul.bf16.gmra.mxu1 %v81_v37 }
  0x80   :  { %463 = vmatmul.bf16.gmra.mxu2 %v81_v37 }
  0x8e   :  { %290 = vmatmul.bf16.gmra.mxu0 %v82_v40  ;;  %419 = vmatmul.bf16.gmra.mxu3 %v974_v28 }
  0x8f   :  { %379 = vmatmul.bf16.gmra.mxu1 %v82_v40 }
  0x90   :  { %468 = vmatmul.bf16.gmra.mxu2 %v82_v40 }
  0x9e   :  { %295 = vmatmul.bf16.gmra.mxu0 %v83_v43  ;;  %424 = vmatmul.bf16.gmra.mxu3 %v981_v34 }
  0x9f   :  { %384 = vmatmul.bf16.gmra.mxu1 %v83_v43 }
  0xa0   :  { %473 = vmatmul.bf16.gmra.mxu2 %v83_v43 }
  0xab   :  { %v261_v47 = vpop.f32.mrf.mxu0 }
  0xac   :  { %v350_v48 = vpop.f32.mrf.mxu1 }
  0xad   :  { %v519_v49 = vpack.c.bf16 %v350_v48, %v261_v47 }
  0xae   :  { %300 = vmatmul.bf16.gmra.mxu0 %v84_v46  ;;  %498 = vmatmul.bf16.vlgmr.msra.gmra.mxu3 %v963_v15 }
  0xaf   :  { %583 = vst [vmem:[#allocation7] sm:$0xff] %v519_v49  ;;  %389 = vmatmul.bf16.gmra.mxu1 %v84_v46 }
  0xb0   :  { %478 = vmatmul.bf16.gmra.mxu2 %v84_v46 }
  0xb1   :  { %v992_v50 = vpop.f32.mrf.mxu3 }
  0xb3   :  { %v439_v51 = vpop.f32.mrf.mxu2  ;;  %v263_v53 = vpop.f32.mrf.mxu0 }
  0xb4   :  { %v520_v52 = vpack.c.bf16 %v439_v51, %v439_v51  ;;  %v352_v54 = vpop.f32.mrf.mxu1 }
  0xb5   :  { %v521_v55 = vpack.c.bf16 %v352_v54, %v263_v53 }
  0xb6   :  { %584 = vst [vmem:[#allocation7 + $0x8] sm:$0xf] %v520_v52 }
  0xb7   :  { %585 = vst [vmem:[#allocation7 + $0xc] sm:$0xff] %v521_v55 }
  0xb9   :  { %v994_v58 = vpop.f32.mrf.mxu3 }
  0xbb   :  { %v441_v59 = vpop.f32.mrf.mxu2  ;;  %v266_v62 = vpop.f32.mrf.mxu0 }
  0xbc   :  { %v522_v61 = vpack.c.bf16 %v441_v59, %v441_v59  ;;  %v355_v63 = vpop.f32.mrf.mxu1 }
  0xbd   :  { %v523_v0 = vpack.c.bf16 %v355_v63, %v266_v62 }
  0xbe   :  { %586 = vst [vmem:[#allocation7 + $0x14] sm:$0xf] %v522_v61  ;;  %305 = vmatmul.bf16.gmra.mxu0 %v85_v60  ;;  %503 = vmatmul.bf16.gmra.mxu3 %v970_v23 }
  0xbf   :  { %587 = vst [vmem:[#allocation7 + $0x18] sm:$0xff] %v523_v0  ;;  %394 = vmatmul.bf16.gmra.mxu1 %v85_v60 }
  0xc0   :  { %483 = vmatmul.bf16.gmra.mxu2 %v85_v60 }
  0xc1   :  { %v997_v1 = vpop.f32.mrf.mxu3 }
  0xc3   :  { %v444_v2 = vpop.f32.mrf.mxu2  ;;  %v268_v4 = vpop.f32.mrf.mxu0 }
  0xc4   :  { %v524_v3 = vpack.c.bf16 %v444_v2, %v444_v2  ;;  %v357_v5 = vpop.f32.mrf.mxu1 }
  0xc5   :  { %v525_v6 = vpack.c.bf16 %v357_v5, %v268_v4 }
  0xc6   :  { %588 = vst [vmem:[#allocation7 + $0x20] sm:$0xf] %v524_v3 }
  0xc7   :  { %589 = vst [vmem:[#allocation7 + $0x24] sm:$0xff] %v525_v6 }
  0xc9   :  { %v999_v11 = vpop.f32.mrf.mxu3 }
  0xcb   :  { %v446_v12 = vpop.f32.mrf.mxu2  ;;  %v271_v15 = vpop.f32.mrf.mxu0 }
  0xcc   :  { %v526_v14 = vpack.c.bf16 %v446_v12, %v446_v12  ;;  %v360_v18 = vpop.f32.mrf.mxu1 }
  0xcd   :  { %v527_v19 = vpack.c.bf16 %v360_v18, %v271_v15 }
  0xce   :  { %590 = vst [vmem:[#allocation7 + $0x2c] sm:$0xf] %v526_v14  ;;  %310 = vmatmul.bf16.gmra.mxu0 %v86_v13  ;;  %508 = vmatmul.bf16.gmra.mxu3 %v974_v28 }
  0xcf   :  { %591 = vst [vmem:[#allocation7 + $0x30] sm:$0xff] %v527_v19  ;;  %399 = vmatmul.bf16.gmra.mxu1 %v86_v13 }
  0xd0   :  { %488 = vmatmul.bf16.gmra.mxu2 %v86_v13 }
  0xd1   :  { %v1002_v20 = vpop.f32.mrf.mxu3 }
  0xd3   :  { %v449_v21 = vpop.f32.mrf.mxu2  ;;  %v273_v23 = vpop.f32.mrf.mxu0 }
  0xd4   :  { %v528_v22 = vpack.c.bf16 %v449_v21, %v449_v21  ;;  %v362_v7 = vpop.f32.mrf.mxu1 }
  0xd5   :  { %v529_v16 = vpack.c.bf16 %v362_v7, %v273_v23 }
  0xd6   :  { %592 = vst [vmem:[#allocation7 + $0x38] sm:$0xf] %v528_v22 }
  0xd7   :  { %593 = vst [vmem:[#allocation7 + $0x3c] sm:$0xff] %v529_v16 }
  0xd9   :  { %v1004_v27 = vpop.f32.mrf.mxu3 }
  0xdb   :  { %v451_v29 = vpop.f32.mrf.mxu2  ;;  %v276_v28 = vpop.f32.mrf.mxu0 }
  0xdc   :  { %v530_v31 = vpack.c.bf16 %v451_v29, %v451_v29  ;;  %v365_v32 = vpop.f32.mrf.mxu1 }
  0xdd   :  { %v531_v33 = vpack.c.bf16 %v365_v32, %v276_v28 }
  0xde   :  { %594 = vst [vmem:[#allocation7 + $0x44] sm:$0xf] %v530_v31  ;;  %315 = vmatmul.bf16.gmra.mxu0 %v87_v30  ;;  %513 = vmatmul.bf16.gmra.mxu3 %v981_v34 }
  0xdf   :  { %595 = vst [vmem:[#allocation7 + $0x48] sm:$0xff] %v531_v33  ;;  %404 = vmatmul.bf16.gmra.mxu1 %v87_v30 }
  0xe0   :  { %493 = vmatmul.bf16.gmra.mxu2 %v87_v30 }
  0xe1   :  { %v1007_v8 = vpop.f32.mrf.mxu3 }
  0xe3   :  { %v454_v17 = vpop.f32.mrf.mxu2  ;;  %v278_v35 = vpop.f32.mrf.mxu0 }
  0xe4   :  { %v532_v26 = vpack.c.bf16 %v454_v17, %v454_v17  ;;  %v367_v36 = vpop.f32.mrf.mxu1 }
  0xe5   :  { %v533_v37 = vpack.c.bf16 %v367_v36, %v278_v35 }
  0xe6   :  { %596 = vst [vmem:[#allocation7 + $0x50] sm:$0xf] %v532_v26 }
  0xe7   :  { %597 = vst [vmem:[#allocation7 + $0x54] sm:$0xff] %v533_v37 }
  0xe9   :  { %v1009_v38 = vpop.f32.mrf.mxu3 }
  0xeb   :  { %v456_v39 = vpop.f32.mrf.mxu2  ;;  %v281_v41 = vpop.f32.mrf.mxu0 }
  0xec   :  { %v534_v40 = vpack.c.bf16 %v456_v39, %v456_v39  ;;  %v370_v42 = vpop.f32.mrf.mxu1 }
  0xed   :  { %v535_v34 = vpack.c.bf16 %v370_v42, %v281_v41 }
  0xee   :  { %598 = vst [vmem:[#allocation7 + $0x5c] sm:$0xf] %v534_v40 }
  0xef   :  { %599 = vst [vmem:[#allocation7 + $0x60] sm:$0xff] %v535_v34 }
  0xf1   :  { %v410_v43 = vpop.f32.mrf.mxu3 }
  0xf2   :  { %v567_v44 = vpack.c.bf16 %v410_v43, %v992_v50 }
  0xf3   :  { %v459_v45 = vpop.f32.mrf.mxu2  ;;  %v283_v47 = vpop.f32.mrf.mxu0 }
  0xf4   :  { %v536_v46 = vpack.c.bf16 %v459_v45, %v459_v45  ;;  %631 = vst [vmem:[#allocation7 + $0x120] sm:$0xff] %v567_v44  ;;  %v372_v48 = vpop.f32.mrf.mxu1 }
  0xf5   :  { %v537_v49 = vpack.c.bf16 %v372_v48, %v283_v47 }
  0xf6   :  { %600 = vst [vmem:[#allocation7 + $0x68] sm:$0xf] %v536_v46 }
  0xf7   :  { %601 = vst [vmem:[#allocation7 + $0x6c] sm:$0xff] %v537_v49 }
  0xf9   :  { %v412_v51 = vpop.f32.mrf.mxu3 }
  0xfa   :  { %v569_v52 = vpack.c.bf16 %v412_v51, %v994_v58 }
  0xfb   :  { %v461_v53 = vpop.f32.mrf.mxu2  ;;  %v286_v55 = vpop.f32.mrf.mxu0 }
  0xfc   :  { %v538_v54 = vpack.c.bf16 %v461_v53, %v461_v53  ;;  %633 = vst [vmem:[#allocation7 + $0x12c] sm:$0xff] %v569_v52  ;;  %v375_v56 = vpop.f32.mrf.mxu1 }
  0xfd   :  { %v539_v57 = vpack.c.bf16 %v375_v56, %v286_v55 }
  0xfe   :  { %602 = vst [vmem:[#allocation7 + $0x74] sm:$0xf] %v538_v54 }
  0xff   :  { %603 = vst [vmem:[#allocation7 + $0x78] sm:$0xff] %v539_v57 }
 0x101   :  { %v415_v50 = vpop.f32.mrf.mxu3 }
 0x102   :  { %v571_v59 = vpack.c.bf16 %v415_v50, %v997_v1 }
 0x103   :  { %v464_v60 = vpop.f32.mrf.mxu2  ;;  %v288_v62 = vpop.f32.mrf.mxu0 }
 0x104   :  { %v540_v61 = vpack.c.bf16 %v464_v60, %v464_v60  ;;  %635 = vst [vmem:[#allocation7 + $0x138] sm:$0xff] %v571_v59  ;;  %v377_v63 = vpop.f32.mrf.mxu1 }
 0x105   :  { %v541_v0 = vpack.c.bf16 %v377_v63, %v288_v62 }
 0x106   :  { %604 = vst [vmem:[#allocation7 + $0x80] sm:$0xf] %v540_v61 }
 0x107   :  { %605 = vst [vmem:[#allocation7 + $0x84] sm:$0xff] %v541_v0 }
 0x109   :  { %v417_v58 = vpop.f32.mrf.mxu3 }
 0x10a   :  { %v573_v2 = vpack.c.bf16 %v417_v58, %v999_v11 }
 0x10b   :  { %v466_v3 = vpop.f32.mrf.mxu2  ;;  %v291_v5 = vpop.f32.mrf.mxu0 }
 0x10c   :  { %v542_v4 = vpack.c.bf16 %v466_v3, %v466_v3  ;;  %637 = vst [vmem:[#allocation7 + $0x144] sm:$0xff] %v573_v2  ;;  %v380_v6 = vpop.f32.mrf.mxu1 }
 0x10d   :  { %v543_v9 = vpack.c.bf16 %v380_v6, %v291_v5 }
 0x10e   :  { %606 = vst [vmem:[#allocation7 + $0x8c] sm:$0xf] %v542_v4 }
 0x10f   :  { %607 = vst [vmem:[#allocation7 + $0x90] sm:$0xff] %v543_v9 }
 0x111   :  { %v420_v1 = vpop.f32.mrf.mxu3 }
 0x112   :  { %v575_v10 = vpack.c.bf16 %v420_v1, %v1002_v20 }
 0x113   :  { %v469_v12 = vpop.f32.mrf.mxu2  ;;  %v293_v14 = vpop.f32.mrf.mxu0 }
 0x114   :  { %v544_v13 = vpack.c.bf16 %v469_v12, %v469_v12  ;;  %639 = vst [vmem:[#allocation7 + $0x150] sm:$0xff] %v575_v10  ;;  %v382_v15 = vpop.f32.mrf.mxu1 }
 0x115   :  { %v545_v18 = vpack.c.bf16 %v382_v15, %v293_v14 }
 0x116   :  { %608 = vst [vmem:[#allocation7 + $0x98] sm:$0xf] %v544_v13 }
 0x117   :  { %609 = vst [vmem:[#allocation7 + $0x9c] sm:$0xff] %v545_v18 }
 0x119   :  { %v422_v11 = vpop.f32.mrf.mxu3 }
 0x11a   :  { %v577_v19 = vpack.c.bf16 %v422_v11, %v1004_v27 }
 0x11b   :  { %v471_v21 = vpop.f32.mrf.mxu2  ;;  %v296_v23 = vpop.f32.mrf.mxu0 }
 0x11c   :  { %v546_v22 = vpack.c.bf16 %v471_v21, %v471_v21  ;;  %641 = vst [vmem:[#allocation7 + $0x15c] sm:$0xff] %v577_v19  ;;  %v385_v7 = vpop.f32.mrf.mxu1 }
 0x11d   :  { %v547_v16 = vpack.c.bf16 %v385_v7, %v296_v23 }
 0x11e   :  { %610 = vst [vmem:[#allocation7 + $0xa4] sm:$0xf] %v546_v22 }
 0x11f   :  { %611 = vst [vmem:[#allocation7 + $0xa8] sm:$0xff] %v547_v16 }
 0x121   :  { %v425_v20 = vpop.f32.mrf.mxu3 }
 0x122   :  { %v579_v24 = vpack.c.bf16 %v425_v20, %v1007_v8 }
 0x123   :  { %v474_v25 = vpop.f32.mrf.mxu2  ;;  %v298_v30 = vpop.f32.mrf.mxu0 }
 0x124   :  { %v548_v29 = vpack.c.bf16 %v474_v25, %v474_v25  ;;  %643 = vst [vmem:[#allocation7 + $0x168] sm:$0xff] %v579_v24  ;;  %v387_v31 = vpop.f32.mrf.mxu1 }
 0x125   :  { %v549_v28 = vpack.c.bf16 %v387_v31, %v298_v30 }
 0x126   :  { %612 = vst [vmem:[#allocation7 + $0xb0] sm:$0xf] %v548_v29 }
 0x127   :  { %613 = vst [vmem:[#allocation7 + $0xb4] sm:$0xff] %v549_v28 }
 0x129   :  { %v427_v27 = vpop.f32.mrf.mxu3 }
 0x12a   :  { %v581_v32 = vpack.c.bf16 %v427_v27, %v1009_v38 }
 0x12b   :  { %v476_v33 = vpop.f32.mrf.mxu2  ;;  %v301_v26 = vpop.f32.mrf.mxu0 }
 0x12c   :  { %v550_v17 = vpack.c.bf16 %v476_v33, %v476_v33  ;;  %645 = vst [vmem:[#allocation7 + $0x174] sm:$0xff] %v581_v32  ;;  %v390_v35 = vpop.f32.mrf.mxu1 }
 0x12d   :  { %v551_v36 = vpack.c.bf16 %v390_v35, %v301_v26 }
 0x12e   :  { %614 = vst [vmem:[#allocation7 + $0xbc] sm:$0xf] %v550_v17 }
 0x12f   :  { %615 = vst [vmem:[#allocation7 + $0xc0] sm:$0xff] %v551_v36 }
 0x131   :  { %v499_v8 = vpop.f32.mrf.mxu3 }
 0x132   :  { %v568_v39 = vpack.c.bf16 %v499_v8, %v499_v8 }
 0x133   :  { %v479_v37 = vpop.f32.mrf.mxu2  ;;  %v303_v41 = vpop.f32.mrf.mxu0 }
 0x134   :  { %v552_v40 = vpack.c.bf16 %v479_v37, %v479_v37  ;;  %632 = vst [vmem:[#allocation7 + $0x128] sm:$0xf] %v568_v39  ;;  %v392_v42 = vpop.f32.mrf.mxu1 }
 0x135   :  { %v553_v34 = vpack.c.bf16 %v392_v42, %v303_v41 }
 0x136   :  { %616 = vst [vmem:[#allocation7 + $0xc8] sm:$0xf] %v552_v40 }
 0x137   :  { %617 = vst [vmem:[#allocation7 + $0xcc] sm:$0xff] %v553_v34 }
 0x139   :  { %v501_v43 = vpop.f32.mrf.mxu3 }
 0x13a   :  { %v570_v44 = vpack.c.bf16 %v501_v43, %v501_v43 }
 0x13b   :  { %v481_v38 = vpop.f32.mrf.mxu2  ;;  %v306_v46 = vpop.f32.mrf.mxu0 }
 0x13c   :  { %v554_v45 = vpack.c.bf16 %v481_v38, %v481_v38  ;;  %634 = vst [vmem:[#allocation7 + $0x134] sm:$0xf] %v570_v44  ;;  %v395_v47 = vpop.f32.mrf.mxu1 }
 0x13d   :  { %v555_v48 = vpack.c.bf16 %v395_v47, %v306_v46 }
 0x13e   :  { %618 = vst [vmem:[#allocation7 + $0xd4] sm:$0xf] %v554_v45 }
 0x13f   :  { %619 = vst [vmem:[#allocation7 + $0xd8] sm:$0xff] %v555_v48 }
 0x141   :  { %v504_v49 = vpop.f32.mrf.mxu3 }
 0x142   :  { %v572_v52 = vpack.c.bf16 %v504_v49, %v504_v49 }
 0x143   :  { %v484_v51 = vpop.f32.mrf.mxu2  ;;  %v308_v54 = vpop.f32.mrf.mxu0 }
 0x144   :  { %v556_v53 = vpack.c.bf16 %v484_v51, %v484_v51  ;;  %636 = vst [vmem:[#allocation7 + $0x140] sm:$0xf] %v572_v52  ;;  %v397_v55 = vpop.f32.mrf.mxu1 }
 0x145   :  { %v557_v56 = vpack.c.bf16 %v397_v55, %v308_v54 }
 0x146   :  { %620 = vst [vmem:[#allocation7 + $0xe0] sm:$0xf] %v556_v53 }
 0x147   :  { %621 = vst [vmem:[#allocation7 + $0xe4] sm:$0xff] %v557_v56 }
 0x149   :  { %v506_v57 = vpop.f32.mrf.mxu3 }
 0x14a   :  { %v574_v59 = vpack.c.bf16 %v506_v57, %v506_v57 }
 0x14b   :  { %v486_v50 = vpop.f32.mrf.mxu2  ;;  %v311_v61 = vpop.f32.mrf.mxu0 }
 0x14c   :  { %v558_v60 = vpack.c.bf16 %v486_v50, %v486_v50  ;;  %638 = vst [vmem:[#allocation7 + $0x14c] sm:$0xf] %v574_v59  ;;  %v400_v62 = vpop.f32.mrf.mxu1 }
 0x14d   :  { %v559_v63 = vpack.c.bf16 %v400_v62, %v311_v61 }
 0x14e   :  { %622 = vst [vmem:[#allocation7 + $0xec] sm:$0xf] %v558_v60 }
 0x14f   :  { %623 = vst [vmem:[#allocation7 + $0xf0] sm:$0xff] %v559_v63 }
 0x151   :  { %v509_v0 = vpop.f32.mrf.mxu3 }
 0x152   :  { %v576_v2 = vpack.c.bf16 %v509_v0, %v509_v0 }
 0x153   :  { %v489_v58 = vpop.f32.mrf.mxu2  ;;  %v313_v4 = vpop.f32.mrf.mxu0 }
 0x154   :  { %v560_v3 = vpack.c.bf16 %v489_v58, %v489_v58  ;;  %640 = vst [vmem:[#allocation7 + $0x158] sm:$0xf] %v576_v2  ;;  %v402_v5 = vpop.f32.mrf.mxu1 }
 0x155   :  { %v561_v6 = vpack.c.bf16 %v402_v5, %v313_v4 }
 0x156   :  { %624 = vst [vmem:[#allocation7 + $0xf8] sm:$0xf] %v560_v3 }
 0x157   :  { %625 = vst [vmem:[#allocation7 + $0xfc] sm:$0xff] %v561_v6 }
 0x159   :  { %v511_v9 = vpop.f32.mrf.mxu3 }
 0x15a   :  { %v578_v10 = vpack.c.bf16 %v511_v9, %v511_v9 }
 0x15b   :  { %v491_v1 = vpop.f32.mrf.mxu2  ;;  %v316_v13 = vpop.f32.mrf.mxu0 }
 0x15c   :  { %v562_v12 = vpack.c.bf16 %v491_v1, %v491_v1  ;;  %642 = vst [vmem:[#allocation7 + $0x164] sm:$0xf] %v578_v10  ;;  %v405_v14 = vpop.f32.mrf.mxu1 }
 0x15d   :  { %v563_v15 = vpack.c.bf16 %v405_v14, %v316_v13 }
 0x15e   :  { %626 = vst [vmem:[#allocation7 + $0x104] sm:$0xf] %v562_v12 }
 0x15f   :  { %627 = vst [vmem:[#allocation7 + $0x108] sm:$0xff] %v563_v15 }
 0x161   :  { %v514_v18 = vpop.f32.mrf.mxu3 }
 0x162   :  { %v580_v19 = vpack.c.bf16 %v514_v18, %v514_v18 }
 0x163   :  { %v494_v11 = vpop.f32.mrf.mxu2  ;;  %v318_v22 = vpop.f32.mrf.mxu0 }
 0x164   :  { %v564_v21 = vpack.c.bf16 %v494_v11, %v494_v11  ;;  %644 = vst [vmem:[#allocation7 + $0x170] sm:$0xf] %v580_v19  ;;  %v407_v23 = vpop.f32.mrf.mxu1 }
 0x165   :  { %v565_v7 = vpack.c.bf16 %v407_v23, %v318_v22 }
 0x166   :  { %628 = vst [vmem:[#allocation7 + $0x110] sm:$0xf] %v564_v21 }
 0x167   :  { %629 = vst [vmem:[#allocation7 + $0x114] sm:$0xff] %v565_v7 }
 0x169   :  { %v516_v16 = vpop.f32.mrf.mxu3 }
 0x16a   :  { %v582_v24 = vpack.c.bf16 %v516_v16, %v516_v16 }
 0x16b   :  { %v496_v20 = vpop.f32.mrf.mxu2 }
 0x16c   :  { %v566_v25 = vpack.c.bf16 %v496_v20, %v496_v20  ;;  %646 = vst [vmem:[#allocation7 + $0x17c] sm:$0xf] %v582_v24 }
 0x16e   :  { %630 = vst [vmem:[#allocation7 + $0x11c] sm:$0xf] %v566_v25 }
 0x16f   :  { %659 = dma.vmem_to_hbm [thread:$0]  %s652_s1, 6144, %s654_s25, [#allocation4], %s900_s21, %s900_s21, %s901_s22  }
 0x170   :  { %894 = dma.done.wait [#allocation4], 6144  }
 0x171   :  { %895 = vsyncadd [#allocation4], 4294961152 }
 0x172   :  { %664 = vsyncpa [#allocation3], 1 }
 0x173   :  { %665 = vsyncpa [#allocation6], 1 }
 0x174   :  { %666 = vsyncpa [#allocation4], 1 }

</bundles_post_ra>
